<compile_context>
chip_gen: v5e
topology: v5e:2x2
jax: 0.10.0
libtpu: 0.0.40
codegen_flags: <defaults>
</compile_context>

<pallas_src>
import math

import jax
import jax.numpy as jnp
from jax.experimental import pallas as pl
from jax.experimental.pallas import tpu as pltpu

# ---- small config (consistent with ViTPatchEmbeddings) ----
B = 2                               # batch
C_IN = 3                            # RGB (fixed by the module)
IMG = 16                            # vit_img_size
PATCH = 8                           # vit_patch_size
GRID = IMG // PATCH
NUM_PATCHES = GRID * GRID           # 4
CLS_FLAG = True                     # vit_cls_flag
D = 128                             # vit_hidden_dim (lane-dense output)
T = NUM_PATCHES + (1 if CLS_FLAG else 0)   # 5 tokens
PATCH_DIM = C_IN * PATCH * PATCH    # 192
K_PAD = 256                         # lane-aligned contraction dim (192 -> 256)
M = B * T                           # 10 output rows
M_PAD = ((M + 7) // 8) * 8          # 16: sublane-aligned -> unmasked full store


def patch_embed_kernel(lhs_ref, w_ref, add_ref, o_ref):
    """lhs_ref: (M_PAD, K_PAD)  w_ref: (K_PAD, D)  add_ref: (M_PAD, D)  o_ref: (M_PAD, D)

    Conv2d with stride == kernel_size is exactly a per-patch linear projection,
    so the whole forward collapses to one MXU matmul plus one VPU add and a
    single lane-dense, sublane-aligned store."""
    o_ref[...] = jnp.dot(lhs_ref[...], w_ref[...],
                         preferred_element_type=jnp.float32) + add_ref[...]


def _extract_patches(x):
    """(B, C, H, W) -> (B, NUM_PATCHES, PATCH_DIM).

    Patch order is row-major over the (H/P, W/P) grid and each patch is
    flattened in (c, i, j) order, matching conv -> flatten(2) -> transpose(1,2)
    with the conv weight flattened as weight.reshape(D, -1).T."""
    b, c, h, w = x.shape
    x = x.reshape(b, c, GRID, PATCH, GRID, PATCH)
    x = x.transpose(0, 2, 4, 1, 3, 5)                 # (B, gh, gw, C, P, P)
    return x.reshape(b, NUM_PATCHES, PATCH_DIM)


def _build_lhs(x):
    """Matmul LHS (M_PAD, K_PAD): per batch a zero CLS-slot row followed by the
    flattened patches; zero pad on both the M tail and the K tail."""
    patches = _extract_patches(x)                               # (B, NP, PATCH_DIM)
    cls_rows = jnp.zeros((B, 1, PATCH_DIM), jnp.float32)
    lhs = jnp.concatenate([cls_rows, patches], axis=1)          # (B, T, PATCH_DIM)
    lhs = lhs.reshape(M, PATCH_DIM)
    return jnp.pad(lhs, ((0, M_PAD - M), (0, K_PAD - PATCH_DIM)))


def _build_add(bias, cls_tok, pos):
    """Fold bias + cls token + position embedding into one additive (M_PAD, D)
    tensor: row 0 of each batch gets cls+pos[0] (its LHS row is zero), patch
    rows get bias+pos[1:]."""
    add_t = jnp.concatenate([cls_tok + pos[0:1, :], bias + pos[1:, :]], axis=0)  # (T, D)
    add = jnp.tile(add_t, (B, 1))                                # (M, D)
    return jnp.pad(add, ((0, M_PAD - M), (0, 0)))


@jax.jit
def vit_patch_embeddings(x, params):
    w, bias, cls_tok, pos = params                    # w already (K_PAD, D), zero-padded
    lhs = _build_lhs(x)
    add = _build_add(bias, cls_tok, pos)
    vmem = pl.BlockSpec(memory_space=pltpu.MemorySpace.VMEM)
    bytes_accessed = 4 * (lhs.size + w.size + add.size + M_PAD * D)
    out = pl.pallas_call(
        patch_embed_kernel,
        out_shape=jax.ShapeDtypeStruct((M_PAD, D), jnp.float32),
        in_specs=[vmem, vmem, vmem],
        out_specs=vmem,
        cost_estimate=pl.CostEstimate(flops=2 * M_PAD * K_PAD * D,
                                      transcendentals=0,
                                      bytes_accessed=bytes_accessed),
    )(lhs, w, add)
    return out[:M].reshape(B, T, D)                   # contiguous slice+reshape: free


def init_params(key):
    kw, kb, kp = jax.random.split(key, 3)
    bound = 1.0 / math.sqrt(PATCH_DIM)                # PyTorch Conv2d default init
    # Conv weight in matmul layout (C*P*P, D) == conv_weight.reshape(D, -1).T,
    # zero-padded on K to 256 (one-time).
    w = jax.random.uniform(kw, (PATCH_DIM, D), jnp.float32, -bound, bound)
    w = jnp.pad(w, ((0, K_PAD - PATCH_DIM), (0, 0)))
    bias = jax.random.uniform(kb, (1, D), jnp.float32, -bound, bound)
    cls_tok = jnp.zeros((1, D), jnp.float32)          # nn.Parameter(torch.zeros)
    pos = jax.random.uniform(kp, (T, D), jnp.float32)  # nn.Parameter(torch.rand)
    return (w, bias, cls_tok, pos)


def vit_patch_embeddings_ref(x, params):
    """Pure-JAX reference using a real strided convolution."""
    w, bias, cls_tok, pos = params
    w_conv = w[:PATCH_DIM].T.reshape(D, C_IN, PATCH, PATCH)
    y = jax.lax.conv_general_dilated(
        x, w_conv, window_strides=(PATCH, PATCH), padding="VALID",
        dimension_numbers=("NCHW", "OIHW", "NCHW"))
    y = y + bias.reshape(1, D, 1, 1)
    y = y.reshape(B, D, NUM_PATCHES).transpose(0, 2, 1)   # flatten(2).transpose(1, 2)
    cls = jnp.broadcast_to(cls_tok.reshape(1, 1, D), (B, 1, D))
    y = jnp.concatenate([cls, y], axis=1)
    return y + pos.reshape(1, T, D)


if __name__ == "__main__":
    key = jax.random.PRNGKey(0)
    kx, kp = jax.random.split(key)
    x = jax.random.normal(kx, (B, C_IN, IMG, IMG), jnp.float32)
    params = init_params(kp)

    out = jax.block_until_ready(vit_patch_embeddings(x, params))

    ref = vit_patch_embeddings_ref(x, params)
    assert out.shape == (B, T, D)
    assert jnp.allclose(out, ref, atol=1e-4, rtol=1e-4), "mismatch vs JAX reference"
    print("KERNEL_OK")
</pallas_src>

<mosaic_0001>
module attributes {stable_mosaic.version = 11 : i64} {
  func.func @patch_embed_kernel(%arg0: memref<16x256xf32, #tpu.memory_space<vmem>>, %arg1: memref<256x128xf32, #tpu.memory_space<vmem>>, %arg2: memref<16x128xf32, #tpu.memory_space<vmem>>, %arg3: memref<16x128xf32, #tpu.memory_space<vmem>>) attributes {dimension_semantics = [], scalar_prefetch = 0 : i64, scratch_operands = 0 : i64, tpu.core_type = #tpu.core_type<tc>} {
    %c0 = arith.constant 0 : index
    %c0_0 = arith.constant 0 : index
    %0 = vector.load %arg0[%c0, %c0_0] : memref<16x256xf32, #tpu.memory_space<vmem>>, vector<16x256xf32>
    %c0_1 = arith.constant 0 : index
    %c0_2 = arith.constant 0 : index
    %1 = vector.load %arg1[%c0_1, %c0_2] : memref<256x128xf32, #tpu.memory_space<vmem>>, vector<256x128xf32>
    %cst = arith.constant dense<0.000000e+00> : vector<16x128xf32>
    %2 = tpu.matmul %0, %1, %cst {dimension_numbers = #tpu.dot_dimension_numbers<[1], [0], [0], [1], [0, 0, 1, 1], [], []>} : vector<16x256xf32>, vector<256x128xf32>, vector<16x128xf32> -> vector<16x128xf32>
    %c0_3 = arith.constant 0 : index
    %c0_4 = arith.constant 0 : index
    %3 = vector.load %arg2[%c0_3, %c0_4] : memref<16x128xf32, #tpu.memory_space<vmem>>, vector<16x128xf32>
    %4 = arith.addf %2, %3 : vector<16x128xf32>
    %c0_5 = arith.constant 0 : index
    %c0_6 = arith.constant 0 : index
    %5 = vector.load %arg3[%c0_5, %c0_6] : memref<16x128xf32, #tpu.memory_space<vmem>>, vector<16x128xf32>
    tpu.vector_store %arg3[%c0_5, %c0_6], %4 {strides = array<i32>} : memref<16x128xf32, #tpu.memory_space<vmem>>, vector<16x128xf32>,
    return
  }
}

</mosaic_0001>

<bundles_post_ra>
// kernel: tile.9
= control target key start
LH: loop header
LB: loop body
LE: loop exit
PB: predicated region body
PF: predicated region fallthrough
CT: control target
= control target key end

     0   :  { %s32_s0 = inlined_call_operand.vmem [shape: f32[2,5,128], index: 0, kind: input, shape index: {}]   ;;  %s33_s1 = inlined_call_operand.vmem [shape: f32[10,128], index: 1, kind: output, shape index: {}]  }
   0x1   :  { %v2_v0 = vld [vmem:[%s32_s0] sm:$0x1f]   ;;  %v8_v1 = vld [vmem:[%s32_s0 + $0x8] sm:$0x1f]  }
   0x2   :  { %3 = vst [vmem:[%s33_s1] sm:$0x1f] %v2_v0  }
   0x3   :  { %9 = vst [vmem:[%s33_s1 + $0x5] sm:$0x1f] %v8_v1  }

// kernel: vit_patch_embeddings.1
= control target key start
LH: loop header
LB: loop body
LE: loop exit
PB: predicated region body
PF: predicated region fallthrough
CT: control target
= control target key end

     0   :  { %s276_s1 = inlined_call_operand.vmem [shape: f32[256,128], index: 1, kind: input, shape index: {}]   ;;  %s277_s0 = inlined_call_operand.vmem [shape: f32[16,256], index: 0, kind: input, shape index: {}]   ;;  %s278_s2 = inlined_call_operand.vmem [shape: f32[16,128], index: 2, kind: input, shape index: {}]   ;;  %s279_s3 = inlined_call_operand.vmem [shape: f32[16,128], index: 3, kind: output, shape index: {}]  }
   0x1   :  { %v33_v0 = vld [vmem:[%s276_s1 + $0x78] sm:$0xff]  ;;  %v32_v1 = vld [vmem:[%s276_s1 + $0x70] sm:$0xff]  ;;  %v31_v4 = vld [vmem:[%s276_s1 + $0x68] sm:$0xff] }
   0x2   :  { %v49_v2 = vld [vmem:[%s276_s1 + $0xf8] sm:$0xff]  ;;  %104 = vmatpush.msra.mxu2 %v33_v0  ;;  %v48_v3 = vld [vmem:[%s276_s1 + $0xf0] sm:$0xff]  ;;  %52 = vmatpush.msra.mxu0 %v33_v0  ;;  %v47_v5 = vld [vmem:[%s276_s1 + $0xe8] sm:$0xff] }
   0x3   :  { %120 = vmatpush.msra.mxu3 %v49_v2  ;;  %75 = vmatpush.msra.mxu1 %v49_v2  ;;  %v30_v6 = vld [vmem:[%s276_s1 + $0x60] sm:$0xff]  ;;  %v29_v8 = vld [vmem:[%s276_s1 + $0x58] sm:$0xff]  ;;  %v28_v10 = vld [vmem:[%s276_s1 + $0x50] sm:$0xff] }
   0x4   :  { %105 = vmatpush.msra.mxu2 %v32_v1  ;;  %53 = vmatpush.msra.mxu0 %v32_v1  ;;  %v46_v7 = vld [vmem:[%s276_s1 + $0xe0] sm:$0xff]  ;;  %v45_v9 = vld [vmem:[%s276_s1 + $0xd8] sm:$0xff]  ;;  %v44_v11 = vld [vmem:[%s276_s1 + $0xd0] sm:$0xff] }
   0x5   :  { %121 = vmatpush.msra.mxu3 %v48_v3  ;;  %76 = vmatpush.msra.mxu1 %v48_v3  ;;  %v27_v12 = vld [vmem:[%s276_s1 + $0x48] sm:$0xff]  ;;  %v26_v14 = vld [vmem:[%s276_s1 + $0x40] sm:$0xff]  ;;  %v25_v16 = vld [vmem:[%s276_s1 + $0x38] sm:$0xff] }
   0x6   :  { %106 = vmatpush.msra.mxu2 %v31_v4  ;;  %54 = vmatpush.msra.mxu0 %v31_v4  ;;  %v43_v13 = vld [vmem:[%s276_s1 + $0xc8] sm:$0xff]  ;;  %v42_v15 = vld [vmem:[%s276_s1 + $0xc0] sm:$0xff]  ;;  %v41_v17 = vld [vmem:[%s276_s1 + $0xb8] sm:$0xff] }
   0x7   :  { %122 = vmatpush.msra.mxu3 %v47_v5  ;;  %77 = vmatpush.msra.mxu1 %v47_v5  ;;  %v24_v18 = vld [vmem:[%s276_s1 + $0x30] sm:$0xff]  ;;  %v23_v20 = vld [vmem:[%s276_s1 + $0x28] sm:$0xff]  ;;  %v22_v22 = vld [vmem:[%s276_s1 + $0x20] sm:$0xff] }
   0x8   :  { %107 = vmatpush.msra.mxu2 %v30_v6  ;;  %55 = vmatpush.msra.mxu0 %v30_v6  ;;  %v40_v19 = vld [vmem:[%s276_s1 + $0xb0] sm:$0xff]  ;;  %v39_v21 = vld [vmem:[%s276_s1 + $0xa8] sm:$0xff]  ;;  %v38_v23 = vld [vmem:[%s276_s1 + $0xa0] sm:$0xff] }
   0x9   :  { %123 = vmatpush.msra.mxu3 %v46_v7  ;;  %78 = vmatpush.msra.mxu1 %v46_v7  ;;  %v21_v24 = vld [vmem:[%s276_s1 + $0x18] sm:$0xff]  ;;  %v20_v26 = vld [vmem:[%s276_s1 + $0x10] sm:$0xff]  ;;  %v19_v28 = vld [vmem:[%s276_s1 + $0x8] sm:$0xff] }
   0xa   :  { %108 = vmatpush.msra.mxu2 %v29_v8  ;;  %56 = vmatpush.msra.mxu0 %v29_v8  ;;  %v37_v25 = vld [vmem:[%s276_s1 + $0x98] sm:$0xff]  ;;  %v36_v27 = vld [vmem:[%s276_s1 + $0x90] sm:$0xff]  ;;  %v35_v29 = vld [vmem:[%s276_s1 + $0x88] sm:$0xff] }
   0xb   :  { %124 = vmatpush.msra.mxu3 %v45_v9  ;;  %79 = vmatpush.msra.mxu1 %v45_v9  ;;  %v18_v30 = vld [vmem:[%s276_s1] sm:$0xff]  ;;  %v16_v32 = vld [vmem:[%s277_s0 + $0x10] sm:$0xff]  ;;  %v17_v33 = vld [vmem:[%s277_s0 + $0x18] sm:$0xff] }
   0xc   :  { %109 = vmatpush.msra.mxu2 %v28_v10  ;;  %57 = vmatpush.msra.mxu0 %v28_v10  ;;  %v34_v31 = vld [vmem:[%s276_s1 + $0x80] sm:$0xff]  ;;  %v15_v35 = vld [vmem:[%s277_s0 + $0x8] sm:$0xff] }
   0xd   :  { %125 = vmatpush.msra.mxu3 %v44_v11  ;;  %80 = vmatpush.msra.mxu1 %v44_v11  ;;  %v14_v34 = vld [vmem:[%s277_s0] sm:$0xff]  ;;  %v51_v40 = vld [vmem:[%s278_s2 + $0x8] sm:$0xff] }
   0xe   :  { %110 = vmatpush.msra.mxu2 %v27_v12  ;;  %58 = vmatpush.msra.mxu0 %v27_v12  ;;  %v50_v36 = vld [vmem:[%s278_s2] sm:$0xff] }
   0xf   :  { %126 = vmatpush.msra.mxu3 %v43_v13  ;;  %81 = vmatpush.msra.mxu1 %v43_v13 }
  0x10   :  { %111 = vmatpush.msra.mxu2 %v26_v14  ;;  %59 = vmatpush.msra.mxu0 %v26_v14 }
  0x11   :  { %127 = vmatpush.msra.mxu3 %v42_v15  ;;  %82 = vmatpush.msra.mxu1 %v42_v15 }
  0x12   :  { %112 = vmatpush.msra.mxu2 %v25_v16  ;;  %60 = vmatpush.msra.mxu0 %v25_v16 }
  0x13   :  { %128 = vmatpush.msra.mxu3 %v41_v17  ;;  %83 = vmatpush.msra.mxu1 %v41_v17 }
  0x14   :  { %113 = vmatpush.msra.mxu2 %v24_v18  ;;  %61 = vmatpush.msra.mxu0 %v24_v18 }
  0x15   :  { %129 = vmatpush.msra.mxu3 %v40_v19  ;;  %84 = vmatpush.msra.mxu1 %v40_v19 }
  0x16   :  { %114 = vmatpush.msra.mxu2 %v23_v20  ;;  %62 = vmatpush.msra.mxu0 %v23_v20 }
  0x17   :  { %130 = vmatpush.msra.mxu3 %v39_v21  ;;  %85 = vmatpush.msra.mxu1 %v39_v21 }
  0x18   :  { %115 = vmatpush.msra.mxu2 %v22_v22  ;;  %63 = vmatpush.msra.mxu0 %v22_v22 }
  0x19   :  { %131 = vmatpush.msra.mxu3 %v38_v23  ;;  %86 = vmatpush.msra.mxu1 %v38_v23 }
  0x1a   :  { %116 = vmatpush.msra.mxu2 %v21_v24  ;;  %64 = vmatpush.msra.mxu0 %v21_v24 }
  0x1b   :  { %132 = vmatpush.msra.mxu3 %v37_v25  ;;  %87 = vmatpush.msra.mxu1 %v37_v25 }
  0x1c   :  { %117 = vmatpush.msra.mxu2 %v20_v26  ;;  %65 = vmatpush.msra.mxu0 %v20_v26 }
  0x1d   :  { %133 = vmatpush.msra.mxu3 %v36_v27  ;;  %88 = vmatpush.msra.mxu1 %v36_v27 }
  0x1e   :  { %118 = vmatpush.msra.mxu2 %v19_v28  ;;  %66 = vmatpush.msra.mxu0 %v19_v28 }
  0x1f   :  { %134 = vmatpush.msra.mxu3 %v35_v29  ;;  %89 = vmatpush.msra.mxu1 %v35_v29 }
  0x20   :  { %119 = vmatpush.msra.mxu2 %v18_v30  ;;  %67 = vmatpush.msra.mxu0 %v18_v30 }
  0x21   :  { %135 = vmatpush.msra.mxu3 %v34_v31  ;;  %71 = vmatmul.f32.vlgmr.msra.gmra.mxu2 %v16_v32 }
  0x22   :  { %94 = vmatmul.f32.vlgmr.msra.gmra.mxu3 %v17_v33  ;;  %90 = vmatpush.msra.mxu1 %v34_v31 }
  0x23   :  { %68 = vmatmul.f32.vlgmr.msra.gmra.mxu0 %v14_v34  ;;  %91 = vmatmul.f32.vlgmr.msra.gmra.mxu1 %v15_v35 }
  0xa0   :  { %v69_v37 = vpop.f32.mrf.mxu0  ;;  %v92_v38 = vpop.f32.mrf.mxu1 }
  0xa1   :  { %v70_v39 = vadd.f32 %v69_v37, %v50_v36 }
  0xa3   :  { %v93_v41 = vadd.f32 %v92_v38, %v70_v39 }
  0xa4   :  { %v72_v42 = vpop.f32.mrf.mxu2 }
  0xa5   :  { %v95_v43 = vpop.f32.mrf.mxu3  ;;  %v73_v44 = vadd.f32 %v72_v42, %v51_v40  ;;  %98 = vst [vmem:[%s279_s3] sm:$0xff] %v93_v41 }
  0xa7   :  { %v96_v45 = vadd.f32 %v95_v43, %v73_v44 }
  0xa9   :  { %99 = vst [vmem:[%s279_s3 + $0x8] sm:$0xff] %v96_v45 }

</bundles_post_ra>
